<compile_context>
chip_gen: v6e
topology: v6e:2x2x1
jax: 0.10.0
libtpu: 0.0.40
codegen_flags: <defaults>
</compile_context>

<pallas_src>
import jax
import jax.numpy as jnp
from jax.experimental import pallas as pl
from jax.experimental.pallas import tpu as pltpu

_LANES = 128                       # lane-dense last dim
_PALLAS_MIN_ELEMS = 1 << 16        # below this, plain XLA wins (launch overhead)


def _round_up(x, m):
    return ((x + m - 1) // m) * m


def _vmem_budget():
    """(per-tile byte budget, vmem_limit_bytes) — v7x-safe default, bigger on v5e/v6e."""
    tile_bytes = 8 * 1024 * 1024          # 8 MiB tile -> ~32 MiB pipelined (in+out, 2x buf)
    vmem_limit = 40 * 1024 * 1024         # fits v7x's 64 MiB physical VMEM with headroom
    try:
        info = pltpu.get_tpu_info()
        cap = getattr(info, "vmem_capacity_bytes", 0) or 0
        if cap >= 96 * 1024 * 1024:       # v5e / v6e: 128 MiB physical VMEM
            tile_bytes = 16 * 1024 * 1024
            vmem_limit = 72 * 1024 * 1024
    except Exception:
        pass
    return tile_bytes, vmem_limit


def _scale_shift_kernel(w_ref, b_ref, x_ref, o_ref):
    # w_ref / b_ref: (1,) float32 scalars in SMEM; x_ref / o_ref: (tile_rows, 128) VMEM tiles.
    w = w_ref[0]
    b = b_ref[0]
    o_ref[...] = (x_ref[...].astype(jnp.float32) * w + b).astype(o_ref.dtype)


def simple_layer_norm(x, weight, bias):
    """Elementwise x * weight + bias with scalar float32 weight/bias (any input shape)."""
    # PyTorch promotes integer inputs against float parameters.
    if not jnp.issubdtype(x.dtype, jnp.floating):
        x = x.astype(jnp.float32)

    orig_shape = x.shape
    dtype = x.dtype
    n = 1
    for s in orig_shape:
        n *= s

    w32 = jnp.asarray(weight, jnp.float32)
    b32 = jnp.asarray(bias, jnp.float32)

    # Fast path: tiny inputs — XLA's fused elementwise op, no Pallas plumbing.
    if n < _PALLAS_MIN_ELEMS:
        return (x.astype(jnp.float32) * w32 + b32).astype(dtype)

    # ---- present a lane-dense (rows, 128) slab to the kernel ----------------
    rows = pl.cdiv(n, _LANES)
    n_pad = rows * _LANES
    flat = x.reshape(-1)
    if n_pad != n:
        # Minimal pad just for the reshape (< 128 elems); Pallas masks the
        # ragged last block along the row dimension, so no block-level padding.
        flat = jnp.pad(flat, (0, n_pad - n))
    x2d = flat.reshape(rows, _LANES)

    # ---- tile sizing ---------------------------------------------------------
    itemsize = jnp.dtype(dtype).itemsize
    sublane = max(8, 32 // itemsize)                     # 8 f32 / 16 bf16 / 32 int8
    tile_bytes, vmem_limit = _vmem_budget()
    budget_rows = max(sublane, (tile_bytes // (_LANES * itemsize)) // sublane * sublane)
    half_rows = max(sublane, _round_up(pl.cdiv(rows, 2), sublane))   # >= 2 grid steps (v7x: 2 TCs)
    tile_rows = max(sublane, min(budget_rows, half_rows))
    grid = (pl.cdiv(rows, tile_rows),)

    out2d = pl.pallas_call(
        _scale_shift_kernel,
        out_shape=jax.ShapeDtypeStruct((rows, _LANES), dtype),
        grid=grid,
        in_specs=[
            pl.BlockSpec(memory_space=pltpu.SMEM),                 # weight (scalar)
            pl.BlockSpec(memory_space=pltpu.SMEM),                 # bias   (scalar)
            pl.BlockSpec((tile_rows, _LANES), lambda i: (i, 0)),   # x tile
        ],
        out_specs=pl.BlockSpec((tile_rows, _LANES), lambda i: (i, 0)),
        compiler_params=pltpu.CompilerParams(
            dimension_semantics=("parallel",),
            vmem_limit_bytes=vmem_limit,
        ),
    )(w32.reshape(1), b32.reshape(1), x2d)

    if n_pad != n:
        return out2d.reshape(-1)[:n].reshape(orig_shape)
    return out2d.reshape(orig_shape)


if __name__ == "__main__":
    key = jax.random.PRNGKey(0)
    S, D = 8, 32                      # seq=8, hidden=32
    d = D                             # the constructor argument

    x = jax.random.normal(key, (S, D), dtype=jnp.float32)

    # Deterministic parameter init, exactly mirroring the PyTorch __init__:
    # both scalar parameters start at the value d.
    weight = jnp.float32(d)
    bias = jnp.float32(d)

    out = jax.block_until_ready(simple_layer_norm(x, weight, bias))
    ref = x * weight + bias
    assert out.shape == x.shape and out.dtype == x.dtype
    assert jnp.allclose(out, ref, atol=1e-6, rtol=1e-6)

    # Exercise the Pallas path:
    k1, k2 = jax.random.split(jax.random.PRNGKey(1))

    # (a) lane-aligned case (n % 128 == 0): completely copy-free wrapper.
    x_aligned = jax.random.normal(k1, (1024, 256), dtype=jnp.float32)
    out_a = jax.block_until_ready(simple_layer_norm(x_aligned, weight, bias))
    assert jnp.allclose(out_a, x_aligned * weight + bias, atol=1e-5, rtol=1e-5)

    # (b) ragged case (n % 128 != 0): minimal pad + multi-step grid + ragged last block.
    x_ragged = jax.random.normal(k2, (1000, 257), dtype=jnp.float32)
    out_r = jax.block_until_ready(simple_layer_norm(x_ragged, weight, bias))
    assert out_r.shape == x_ragged.shape
    assert jnp.allclose(out_r, x_ragged * weight + bias, atol=1e-5, rtol=1e-5)

    print("KERNEL_OK")
</pallas_src>

<mosaic_0001>
module attributes {stable_mosaic.version = 11 : i64} {
  func.func @_scale_shift_kernel(%arg0: i32, %arg1: memref<1xf32, #tpu.memory_space<smem>>, %arg2: memref<1xf32, #tpu.memory_space<smem>>, %arg3: memref<1024x128xf32, #tpu.memory_space<vmem>>, %arg4: memref<1024x128xf32, #tpu.memory_space<vmem>>) attributes {dimension_semantics = [#tpu.dimension_semantics<parallel>], iteration_bounds = array<i64: 2>, scalar_prefetch = 0 : i64, scratch_operands = 0 : i64, tpu.core_type = #tpu.core_type<tc>, window_params = [{transform_indices = @transform_0, window_bounds = array<i64: 1>}, {transform_indices = @transform_1, window_bounds = array<i64: 1>}, {transform_indices = @transform_2, window_bounds = array<i64: 1024, 128>}, {transform_indices = @transform_3, window_bounds = array<i64: 1024, 128>}]} {
    %c0 = arith.constant 0 : index
    %0 = memref.load %arg1[%c0] : memref<1xf32, #tpu.memory_space<smem>>
    %c0_0 = arith.constant 0 : index
    %1 = memref.load %arg2[%c0_0] : memref<1xf32, #tpu.memory_space<smem>>
    %c0_1 = arith.constant 0 : index
    %c0_2 = arith.constant 0 : index
    %2 = vector.load %arg3[%c0_1, %c0_2] : memref<1024x128xf32, #tpu.memory_space<vmem>>, vector<1024x128xf32>
    %3 = vector.broadcast %0 : f32 to vector<1024x128xf32>
    %4 = arith.mulf %2, %3 : vector<1024x128xf32>
    %5 = vector.broadcast %1 : f32 to vector<1024x128xf32>
    %6 = arith.addf %4, %5 : vector<1024x128xf32>
    %c0_3 = arith.constant 0 : index
    %c0_4 = arith.constant 0 : index
    %7 = vector.load %arg4[%c0_3, %c0_4] : memref<1024x128xf32, #tpu.memory_space<vmem>>, vector<1024x128xf32>
    tpu.vector_store %arg4[%c0_3, %c0_4], %6 {strides = array<i32>} : memref<1024x128xf32, #tpu.memory_space<vmem>>, vector<1024x128xf32>,
    return
  }
  func.func @transform_0(%arg0: i32) -> i32 {
    %c0_i32 = arith.constant 0 : i32
    %c0_i32_0 = arith.constant 0 : i32
    return %c0_i32 : i32
  }
  func.func @transform_1(%arg0: i32) -> i32 {
    %c0_i32 = arith.constant 0 : i32
    %c0_i32_0 = arith.constant 0 : i32
    return %c0_i32 : i32
  }
  func.func @transform_2(%arg0: i32) -> (i32, i32) {
    %c0_i32 = arith.constant 0 : i32
    %c0_i32_0 = arith.constant 0 : i32
    return %arg0, %c0_i32 : i32, i32
  }
  func.func @transform_3(%arg0: i32) -> (i32, i32) {
    %c0_i32 = arith.constant 0 : i32
    %c0_i32_0 = arith.constant 0 : i32
    return %arg0, %c0_i32 : i32, i32
  }
}

</mosaic_0001>

<bundles_post_ra>
// kernel: tpu_custom_call.1
= control target key start
LH: loop header
LB: loop body
LE: loop exit
PB: predicated region body
PF: predicated region fallthrough
CT: control target
= control target key end

     0   :  { %s1667_s0 = inlined_call_operand.<no memory space> [shape: f32[1], index: 0, kind: input, shape index: {}]   ;;  %s1668_s1 = inlined_call_operand.<no memory space> [shape: f32[1], index: 1, kind: input, shape index: {}]   ;;  %s1669_s2 = inlined_call_operand.hbm [shape: f32[2048,128], index: 2, kind: input, shape index: {}]   ;;  %s1670_s3 = inlined_call_operand.hbm [shape: f32[2048,128], index: 3, kind: output, shape index: {}]  }
   0x1   :  { %8 = sst [smem:[#allocation2]] %s1667_s0 }
   0x2   :  { %9 = sst [smem:[#allocation3]] %s1668_s1 }
   0x3   :  { %10 = vsyncpa [#allocation5], 0 }
   0x4   :  { %12 = vsyncpa [#allocation5 + $0x1], 0 }
   0x5   :  { %13 = vsyncpa [#allocation6], 0 }
   0x6   :  { %15 = vsyncpa [#allocation6 + $0x1], 0  ;;  %s988_s16 = smov 0   ;;  %s990_s17 = smov 0  }
   0x7   :  { %s992_s18 = smov 0   ;;  %s994_s19 = smov 0  }
   0x8 LB: > { %s1009_s0 = sadd.s32 4294967295, %s954_s19   ;;  %s796_s1 = sadd.s32 4294967294, %s954_s19   ;;  %s954_s19 = sphi %s994_s19, %s1685_s19   ;;  %s950_s18 = sphi %s992_s18, %s1684_s18   ;;  %s946_s17 = sphi %s990_s17, %s1683_s17   ;;  %s942_s16 = sphi %s988_s16, %s1682_s16  }
   0x9   : > { %s1013_s20 = sadd.s32 1, %s954_s19   ;;  %s70_s21 = sadd.s32 1, %s950_s18 }
   0xa   : > { %s67_s22 = ssub.s32 %s954_s19, %s1013_s20  ;;  %p77_p0 = scmp.ne.s32.totalorder %s950_s18, %s946_s17 }
   0xb   : > { %p68_p1 = scmp.eq.s32.totalorder %s67_s22, 0  ;;  %p78_p2 = scmp.eq.s32.totalorder %s954_s19, 0 }
   0xc   : > { %p83_p3 = scmp.ne.s32.totalorder %s946_s17, %s942_s16  ;;  %p84_p4 = scmp.eq.s32.totalorder %s1009_s0, 0 }
   0xd   : > { %s1025_s23 = scalar_select %p68_p1, %s950_s18, %s70_s21  }
   0xe   : > { %p1027_p5 = por %p78_p2, %p77_p0  ;;  %p1031_p6 = por %p84_p4, %p83_p3 }
   0xf   : > { %p107_p7 = scmp.eq.s32.totalorder %s1009_s0, 1  ;;  %p113_p8 = scmp.eq.s32.totalorder %s796_s1, 1 }
  0x10   : > { %s1674_s25 = scalar_select %p1031_p6, 1, 0 }
  0x11   : > { %p824_p10 = scmp.lt.s32.totalorder %s954_s19, 2  ;;  %p1038_p11 = por %p107_p7, %p77_p0 }
  0x12   : > { %p1042_p12 = por %p113_p8, %p83_p3  ;;  %s139_s28 = sand.u32 1, %s950_s18  }
  0x13   : > { %s1675_s26 = scalar_select %p1038_p11, 1, 0 }
  0x14   : > { %s1676_s27 = scalar_select %p1042_p12, 1, 0 }
  0x15   : > { %s810_s29 = sshll.u32 %s954_s19, 14  ;;  %s799_s30 = sshll.u32 %s139_s28, 10 }
  0x16   : > { %s1051_s6 = scalar_lea.hbm %s1669_s2, %s810_s29  ;;  %s143_s7 = scalar_lea.vmem [#allocation4], %s799_s30 }
  0x17   : > { %s150_s8 = sshll.u32 %s143_s7, 4  ;;  %p1055_p13 = pnand %p824_p10, %p1027_p5  ;;  %s1059_s8 = int_to_ptr.vmem [resolvable:$true] %s150_s8 }
  0x18   : > { %s1061_s10 = scalar_lea.sflag [#allocation5], %s139_s28  ;;  %s862_s11 = scalar_lea.hbm %s1051_s6, 16384 }
  0x19   : > { %p863_p0 = scmp.ne.s32.totalorder %s1051_s6, %s862_s11  ;;  %p864_p1 = pneg %p1055_p13 }
  0x1a   : > { %s867_s14 = scalar_lea.hbm %s1669_s2, 32768  ;;  %p868_p4 = scmp.lt.s32.totalorder %s1051_s6, %s1669_s2 }
  0x1b   : > { %p865_p2 = pnand %p864_p1, %p863_p0  ;;  %p869_p5 = scmp.lt.s32.totalorder %s867_s14, %s862_s11 }
  0x1d   : > { %p866_p3 = pneg %p865_p2  ;;  %p870_p7 = por %p869_p5, %p868_p4 }
  0x1f   : > { %p871_p8 = pnand %p870_p7, %p866_p3 }
  0x21   : > { %874 = shalt.err (!%p871_p8)
}
  0x22   : > { %s875_s21 = scalar_lea.vmem %s1059_s8, 16384  ;;  %s956_s22 = smov [#allocation4]  }
  0x23   : > { %p876_p10 = scmp.ne.s32.totalorder %s1059_s8, %s875_s21  ;;  %s880_s24 = sshll.u32 %s956_s22, 4  ;;  %s881_s24 = int_to_ptr.vmem [resolvable:$false] %s880_s24 }
  0x24   : > { %s882_s28 = scalar_lea.vmem %s881_s24, 32768  ;;  %p883_p2 = scmp.lt.s32.totalorder %s1059_s8, %s881_s24 }
  0x25   : > { %p878_p9 = pnand %p876_p10, %p864_p1  ;;  %p884_p12 = scmp.lt.s32.totalorder %s882_s28, %s875_s21 }
  0x27   : > { %p879_p0 = pneg %p878_p9  ;;  %p885_p11 = por %p884_p12, %p883_p2 }
  0x29   : > { %p886_p6 = pnand %p885_p11, %p879_p0 }
  0x2b   : > { %889 = shalt.err (!%p886_p6)
}
  0x2c   : > { %s957_s29 = smov 128   ;;  %s958_s30 = smov 8  }
  0x2d   : > { %819 = dma.hbm_to_vmem [thread:$0]  (!%p1055_p13), %s1051_s6, 16384, %s1059_s8, %s1061_s10, %s957_s29, %s957_s29, %s958_s30  }
  0x2e   : > { %p802_p9 = scmp.ge.s32.totalorder %s954_s19, 1  ;;  %p158_p1 = scmp.lt.s32.totalorder %s954_s19, 3 }
  0x30   : > { %p159_p3 = pnand %p802_p9, %p158_p1 }
  0x31   : > { %s1085_s4 = sand.u32 (!%p159_p3), 1, %s946_s17   ;;  %p1678_p6 = scmp.ne.s32.totalorder (!%p159_p3), %s1674_s25, 0 }
  0x32   : > { %162 = sbr.rel (%p159_p3) target bundleno = 156 (0x9c), region = 32  ;;  %s803_s5 = sshll.u32 (!%p159_p3), %s1085_s4, 10 }
  0x33   : > { %s165_s7 = scalar_lea.sflag (!%p159_p3), [#allocation5], %s1085_s4  ;;  %s1091_s11 = scalar_lea.vmem (!%p159_p3), [#allocation4], %s803_s5 }
  0x37   : > { %933 = dma.done.wait (%p1678_p6), %s165_s7, 16384  }
  0x38   : > { %935 = vsyncadd (%p1678_p6), %s165_s7, 4294950912  ;;  %s193_s6 = sld [smem:[#allocation2]]  ;;  %v195_v0 = vld [vmem:[%s1091_s11] sm:$0xff]  ;;  %v196_v2 = vld [vmem:[%s1091_s11 + $0x8] sm:$0xff]  ;;  %s1132_s25 = scalar_lea.vmem [#allocation7], %s803_s5 }
  0x39   : > { %s194_s8 = sld [smem:[#allocation3]]  ;;  %v197_v3 = vld [vmem:[%s1091_s11 + $0x10] sm:$0xff]  ;;  %v198_v8 = vld [vmem:[%s1091_s11 + $0x18] sm:$0xff]  ;;  %v199_v9 = vld [vmem:[%s1091_s11 + $0x20] sm:$0xff]  ;;  %s811_s9 = sshll.u32 %s1009_s0, 14 }
  0x3a   : > { %v200_v10 = vld [vmem:[%s1091_s11 + $0x28] sm:$0xff]  ;;  %v201_v14 = vld [vmem:[%s1091_s11 + $0x30] sm:$0xff]  ;;  %v202_v15 = vld [vmem:[%s1091_s11 + $0x38] sm:$0xff]  ;;  %s723_s10 = sshll.u32 %s1132_s25, 4  ;;  %s1616_s13 = scalar_lea.hbm %s1670_s3, %s811_s9  ;;  %s1622_s10 = int_to_ptr.vmem [resolvable:$true] %s723_s10 }
  0x3b   : > { %v203_v16 = vld [vmem:[%s1091_s11 + $0x40] sm:$0xff]  ;;  %v204_v21 = vld [vmem:[%s1091_s11 + $0x48] sm:$0xff]  ;;  %v205_v22 = vld [vmem:[%s1091_s11 + $0x50] sm:$0xff]  ;;  %s710_s14 = scalar_lea.sflag [#allocation6], %s1085_s4  ;;  %s890_s15 = scalar_lea.vmem %s1622_s10, 16384 }
  0x3c   : > { %v206_v23 = vld [vmem:[%s1091_s11 + $0x58] sm:$0xff]  ;;  %v207_v28 = vld [vmem:[%s1091_s11 + $0x60] sm:$0xff]  ;;  %v208_v29 = vld [vmem:[%s1091_s11 + $0x68] sm:$0xff]  ;;  %p891_p11 = scmp.ne.s32.totalorder %s1622_s10, %s890_s15  ;;  %p1679_p12 = scmp.ne.s32.totalorder %s1675_s26, 0 }
  0x3d   : > { %v209_v30 = vld [vmem:[%s1091_s11 + $0x70] sm:$0xff]  ;;  %v210_v35 = vld [vmem:[%s1091_s11 + $0x78] sm:$0xff]  ;;  %v211_v40 = vld [vmem:[%s1091_s11 + $0x80] sm:$0xff]  ;;  %s959_s1 = smov [#allocation7]  }
  0x3e   : > { %v1098_v1 = vstv %s193_s6  ;;  %v212_v41 = vld [vmem:[%s1091_s11 + $0x88] sm:$0xff]  ;;  %v213_v42 = vld [vmem:[%s1091_s11 + $0x90] sm:$0xff]  ;;  %v214_v47 = vld [vmem:[%s1091_s11 + $0x98] sm:$0xff]  ;;  %p892_p13 = pnand %p891_p11, %p1679_p12  ;;  %s894_s21 = sshll.u32 %s959_s1, 4  ;;  %s895_s21 = int_to_ptr.vmem [resolvable:$false] %s894_s21 }
  0x3f   : > { %v324_v4 = vmul.f32 %v1098_v1, %v195_v0  ;;  %v1103_v5 = vstv %s194_s8  ;;  %v325_v6 = vmul.f32 %v1098_v1, %v196_v2  ;;  %v326_v7 = vmul.f32 %v1098_v1, %v197_v3  ;;  %v215_v48 = vld [vmem:[%s1091_s11 + $0xa0] sm:$0xff]  ;;  %v216_v49 = vld [vmem:[%s1091_s11 + $0xa8] sm:$0xff]  ;;  %v217_v54 = vld [vmem:[%s1091_s11 + $0xb0] sm:$0xff]  ;;  %s896_s22 = scalar_lea.vmem %s895_s21, 32768  ;;  %p897_p5 = scmp.lt.s32.totalorder %s1622_s10, %s895_s21 }
  0x40   : > { %v327_v11 = vmul.f32 %v1098_v1, %v198_v8  ;;  %v328_v12 = vmul.f32 %v1098_v1, %v199_v9  ;;  %v329_v13 = vmul.f32 %v1098_v1, %v200_v10  ;;  %v330_v20 = vmul.f32 %v1098_v1, %v201_v14  ;;  %v218_v59 = vld [vmem:[%s1091_s11 + $0xb8] sm:$0xff]  ;;  %v219_v0 = vld [vmem:[%s1091_s11 + $0xc0] sm:$0xff]  ;;  %v220_v2 = vld [vmem:[%s1091_s11 + $0xc8] sm:$0xff]  ;;  %p893_p4 = pneg %p892_p13  ;;  %p898_p7 = scmp.lt.s32.totalorder %s896_s22, %s890_s15 }
  0x41   : > { %v453_v17 = vadd.f32 %v1103_v5, %v324_v4  ;;  %v454_v18 = vadd.f32 %v1103_v5, %v325_v6  ;;  %v455_v19 = vadd.f32 %v1103_v5, %v326_v7  ;;  %v331_v27 = vmul.f32 %v1098_v1, %v202_v15  ;;  %v221_v3 = vld [vmem:[%s1091_s11 + $0xd0] sm:$0xff]  ;;  %v222_v9 = vld [vmem:[%s1091_s11 + $0xd8] sm:$0xff]  ;;  %v223_v10 = vld [vmem:[%s1091_s11 + $0xe0] sm:$0xff] }
  0x42   : > { %v456_v24 = vadd.f32 %v1103_v5, %v327_v11  ;;  %v457_v25 = vadd.f32 %v1103_v5, %v328_v12  ;;  %v458_v26 = vadd.f32 %v1103_v5, %v329_v13  ;;  %v459_v31 = vadd.f32 %v1103_v5, %v330_v20  ;;  %v224_v11 = vld [vmem:[%s1091_s11 + $0xe8] sm:$0xff]  ;;  %p899_p8 = por %p898_p7, %p897_p5 }
  0x43   : > { %581 = vst [vmem:[%s1132_s25] sm:$0xff] %v453_v17  ;;  %582 = vst [vmem:[%s1132_s25 + $0x8] sm:$0xff] %v454_v18  ;;  %v332_v32 = vmul.f32 %v1098_v1, %v203_v16  ;;  %v333_v33 = vmul.f32 %v1098_v1, %v204_v21  ;;  %v334_v34 = vmul.f32 %v1098_v1, %v205_v22  ;;  %v225_v16 = vld [vmem:[%s1091_s11 + $0xf0] sm:$0xff]  ;;  %v226_v21 = vld [vmem:[%s1091_s11 + $0xf8] sm:$0xff] }
  0x44   : > { %583 = vst [vmem:[%s1132_s25 + $0x10] sm:$0xff] %v455_v19  ;;  %584 = vst [vmem:[%s1132_s25 + $0x18] sm:$0xff] %v456_v24  ;;  %v460_v36 = vadd.f32 %v1103_v5, %v331_v27  ;;  %v335_v37 = vmul.f32 %v1098_v1, %v206_v23  ;;  %v336_v38 = vmul.f32 %v1098_v1, %v207_v28  ;;  %v228_v27 = vld [vmem:[%s1091_s11 + $0x108] sm:$0xff]  ;;  %v229_v28 = vld [vmem:[%s1091_s11 + $0x110] sm:$0xff]  ;;  %p900_p10 = pnand %p899_p8, %p893_p4 }
  0x45   : > { %585 = vst [vmem:[%s1132_s25 + $0x20] sm:$0xff] %v457_v25  ;;  %586 = vst [vmem:[%s1132_s25 + $0x28] sm:$0xff] %v458_v26  ;;  %v337_v39 = vmul.f32 %v1098_v1, %v208_v29  ;;  %v461_v43 = vadd.f32 %v1103_v5, %v332_v32  ;;  %v462_v44 = vadd.f32 %v1103_v5, %v333_v33  ;;  %v227_v26 = vld [vmem:[%s1091_s11 + $0x100] sm:$0xff]  ;;  %v230_v33 = vld [vmem:[%s1091_s11 + $0x118] sm:$0xff] }
  0x46   : > { %587 = vst [vmem:[%s1132_s25 + $0x30] sm:$0xff] %v459_v31  ;;  %v463_v45 = vadd.f32 %v1103_v5, %v334_v34  ;;  %v338_v46 = vmul.f32 %v1098_v1, %v209_v30  ;;  %588 = vst [vmem:[%s1132_s25 + $0x38] sm:$0xff] %v460_v36  ;;  %v464_v50 = vadd.f32 %v1103_v5, %v335_v37  ;;  %v231_v34 = vld [vmem:[%s1091_s11 + $0x120] sm:$0xff] }
  0x47   : > { %v465_v51 = vadd.f32 %v1103_v5, %v336_v38  ;;  %v466_v52 = vadd.f32 %v1103_v5, %v337_v39  ;;  %v339_v53 = vmul.f32 %v1098_v1, %v210_v35  ;;  %589 = vst [vmem:[%s1132_s25 + $0x40] sm:$0xff] %v461_v43  ;;  %590 = vst [vmem:[%s1132_s25 + $0x48] sm:$0xff] %v462_v44  ;;  %v232_v35 = vld [vmem:[%s1091_s11 + $0x128] sm:$0xff] }
  0x48   : > { %591 = vst [vmem:[%s1132_s25 + $0x50] sm:$0xff] %v463_v45  ;;  %v467_v55 = vadd.f32 %v1103_v5, %v338_v46  ;;  %v340_v56 = vmul.f32 %v1098_v1, %v211_v40  ;;  %v341_v57 = vmul.f32 %v1098_v1, %v212_v41  ;;  %v342_v58 = vmul.f32 %v1098_v1, %v213_v42  ;;  %v233_v40 = vld [vmem:[%s1091_s11 + $0x130] sm:$0xff]  ;;  %v234_v45 = vld [vmem:[%s1091_s11 + $0x138] sm:$0xff] }
  0x49   : > { %592 = vst [vmem:[%s1132_s25 + $0x58] sm:$0xff] %v464_v50  ;;  %593 = vst [vmem:[%s1132_s25 + $0x60] sm:$0xff] %v465_v51  ;;  %v468_v60 = vadd.f32 %v1103_v5, %v339_v53  ;;  %v343_v61 = vmul.f32 %v1098_v1, %v214_v47  ;;  %v344_v62 = vmul.f32 %v1098_v1, %v215_v48  ;;  %v235_v50 = vld [vmem:[%s1091_s11 + $0x140] sm:$0xff]  ;;  %v236_v51 = vld [vmem:[%s1091_s11 + $0x148] sm:$0xff] }
  0x4a   : > { %594 = vst [vmem:[%s1132_s25 + $0x68] sm:$0xff] %v466_v52  ;;  %v345_v63 = vmul.f32 %v1098_v1, %v216_v49  ;;  %595 = vst [vmem:[%s1132_s25 + $0x70] sm:$0xff] %v467_v55  ;;  %v469_v4 = vadd.f32 %v1103_v5, %v340_v56  ;;  %v470_v6 = vadd.f32 %v1103_v5, %v341_v57  ;;  %v237_v52 = vld [vmem:[%s1091_s11 + $0x150] sm:$0xff]  ;;  %v238_v57 = vld [vmem:[%s1091_s11 + $0x158] sm:$0xff] }
  0x4b   : > { %v471_v7 = vadd.f32 %v1103_v5, %v342_v58  ;;  %v346_v8 = vmul.f32 %v1098_v1, %v217_v54  ;;  %596 = vst [vmem:[%s1132_s25 + $0x78] sm:$0xff] %v468_v60  ;;  %v472_v12 = vadd.f32 %v1103_v5, %v343_v61  ;;  %v473_v13 = vadd.f32 %v1103_v5, %v344_v62  ;;  %v239_v58 = vld [vmem:[%s1091_s11 + $0x160] sm:$0xff] }
  0x4c   : > { %v474_v14 = vadd.f32 %v1103_v5, %v345_v63  ;;  %v347_v15 = vmul.f32 %v1098_v1, %v218_v59  ;;  %597 = vst [vmem:[%s1132_s25 + $0x80] sm:$0xff] %v469_v4  ;;  %598 = vst [vmem:[%s1132_s25 + $0x88] sm:$0xff] %v470_v6  ;;  %v348_v18 = vmul.f32 %v1098_v1, %v219_v0  ;;  %v240_v59 = vld [vmem:[%s1091_s11 + $0x168] sm:$0xff]  ;;  %v241_v0 = vld [vmem:[%s1091_s11 + $0x170] sm:$0xff] }
  0x4d   : > { %599 = vst [vmem:[%s1132_s25 + $0x90] sm:$0xff] %v471_v7  ;;  %v475_v17 = vadd.f32 %v1103_v5, %v346_v8  ;;  %v349_v19 = vmul.f32 %v1098_v1, %v220_v2  ;;  %v350_v20 = vmul.f32 %v1098_v1, %v221_v3  ;;  %600 = vst [vmem:[%s1132_s25 + $0x98] sm:$0xff] %v472_v12  ;;  %v242_v7 = vld [vmem:[%s1091_s11 + $0x178] sm:$0xff]  ;;  %v243_v12 = vld [vmem:[%s1091_s11 + $0x180] sm:$0xff] }
  0x4e   : > { %601 = vst [vmem:[%s1132_s25 + $0xa0] sm:$0xff] %v473_v13  ;;  %602 = vst [vmem:[%s1132_s25 + $0xa8] sm:$0xff] %v474_v14  ;;  %v476_v22 = vadd.f32 %v1103_v5, %v347_v15  ;;  %v351_v23 = vmul.f32 %v1098_v1, %v222_v9  ;;  %v352_v24 = vmul.f32 %v1098_v1, %v223_v10  ;;  %v244_v13 = vld [vmem:[%s1091_s11 + $0x188] sm:$0xff]  ;;  %v245_v14 = vld [vmem:[%s1091_s11 + $0x190] sm:$0xff] }
  0x4f   : > { %v353_v25 = vmul.f32 %v1098_v1, %v224_v11  ;;  %603 = vst [vmem:[%s1132_s25 + $0xb0] sm:$0xff] %v475_v17  ;;  %v477_v29 = vadd.f32 %v1103_v5, %v348_v18  ;;  %v478_v30 = vadd.f32 %v1103_v5, %v349_v19  ;;  %v479_v31 = vadd.f32 %v1103_v5, %v350_v20  ;;  %v246_v19 = vld [vmem:[%s1091_s11 + $0x198] sm:$0xff]  ;;  %v247_v20 = vld [vmem:[%s1091_s11 + $0x1a0] sm:$0xff] }
  0x50   : > { %v354_v32 = vmul.f32 %v1098_v1, %v225_v16  ;;  %604 = vst [vmem:[%s1132_s25 + $0xb8] sm:$0xff] %v476_v22  ;;  %v480_v36 = vadd.f32 %v1103_v5, %v351_v23  ;;  %v481_v37 = vadd.f32 %v1103_v5, %v352_v24  ;;  %v355_v39 = vmul.f32 %v1098_v1, %v226_v21  ;;  %v248_v21 = vld [vmem:[%s1091_s11 + $0x1a8] sm:$0xff] }
  0x51   : > { %v482_v38 = vadd.f32 %v1103_v5, %v353_v25  ;;  %605 = vst [vmem:[%s1132_s25 + $0xc0] sm:$0xff] %v477_v29  ;;  %606 = vst [vmem:[%s1132_s25 + $0xc8] sm:$0xff] %v478_v30  ;;  %v356_v42 = vmul.f32 %v1098_v1, %v227_v26  ;;  %v357_v43 = vmul.f32 %v1098_v1, %v228_v27  ;;  %v249_v26 = vld [vmem:[%s1091_s11 + $0x1b0] sm:$0xff] }
  0x52   : > { %607 = vst [vmem:[%s1132_s25 + $0xd0] sm:$0xff] %v479_v31  ;;  %v483_v41 = vadd.f32 %v1103_v5, %v354_v32  ;;  %v358_v44 = vmul.f32 %v1098_v1, %v229_v28  ;;  %608 = vst [vmem:[%s1132_s25 + $0xd8] sm:$0xff] %v480_v36  ;;  %v484_v46 = vadd.f32 %v1103_v5, %v355_v39  ;;  %v250_v31 = vld [vmem:[%s1091_s11 + $0x1b8] sm:$0xff]  ;;  %v251_v36 = vld [vmem:[%s1091_s11 + $0x1c0] sm:$0xff] }
  0x53   : > { %609 = vst [vmem:[%s1132_s25 + $0xe0] sm:$0xff] %v481_v37  ;;  %610 = vst [vmem:[%s1132_s25 + $0xe8] sm:$0xff] %v482_v38  ;;  %v359_v47 = vmul.f32 %v1098_v1, %v230_v33  ;;  %v360_v48 = vmul.f32 %v1098_v1, %v231_v34  ;;  %v361_v49 = vmul.f32 %v1098_v1, %v232_v35  ;;  %v252_v37 = vld [vmem:[%s1091_s11 + $0x1c8] sm:$0xff]  ;;  %v253_v38 = vld [vmem:[%s1091_s11 + $0x1d0] sm:$0xff] }
  0x54   : > { %611 = vst [vmem:[%s1132_s25 + $0xf0] sm:$0xff] %v483_v41  ;;  %v485_v53 = vadd.f32 %v1103_v5, %v356_v42  ;;  %v486_v54 = vadd.f32 %v1103_v5, %v357_v43  ;;  %v487_v55 = vadd.f32 %v1103_v5, %v358_v44  ;;  %v362_v56 = vmul.f32 %v1098_v1, %v233_v40  ;;  %v254_v43 = vld [vmem:[%s1091_s11 + $0x1d8] sm:$0xff]  ;;  %v255_v44 = vld [vmem:[%s1091_s11 + $0x1e0] sm:$0xff] }
  0x55   : > { %612 = vst [vmem:[%s1132_s25 + $0xf8] sm:$0xff] %v484_v46  ;;  %v488_v60 = vadd.f32 %v1103_v5, %v359_v47  ;;  %v489_v61 = vadd.f32 %v1103_v5, %v360_v48  ;;  %v490_v62 = vadd.f32 %v1103_v5, %v361_v49  ;;  %v363_v63 = vmul.f32 %v1098_v1, %v234_v45  ;;  %v256_v45 = vld [vmem:[%s1091_s11 + $0x1e8] sm:$0xff] }
  0x56   : > { %613 = vst [vmem:[%s1132_s25 + $0x100] sm:$0xff] %v485_v53  ;;  %614 = vst [vmem:[%s1132_s25 + $0x108] sm:$0xff] %v486_v54  ;;  %v491_v2 = vadd.f32 %v1103_v5, %v362_v56  ;;  %v364_v3 = vmul.f32 %v1098_v1, %v235_v50  ;;  %v365_v4 = vmul.f32 %v1098_v1, %v236_v51  ;;  %v257_v50 = vld [vmem:[%s1091_s11 + $0x1f0] sm:$0xff] }
  0x57   : > { %615 = vst [vmem:[%s1132_s25 + $0x110] sm:$0xff] %v487_v55  ;;  %v366_v6 = vmul.f32 %v1098_v1, %v237_v52  ;;  %616 = vst [vmem:[%s1132_s25 + $0x118] sm:$0xff] %v488_v60  ;;  %v492_v8 = vadd.f32 %v1103_v5, %v363_v63  ;;  %v367_v9 = vmul.f32 %v1098_v1, %v238_v57  ;;  %v258_v55 = vld [vmem:[%s1091_s11 + $0x1f8] sm:$0xff]  ;;  %v259_v60 = vld [vmem:[%s1091_s11 + $0x200] sm:$0xff] }
  0x58   : > { %617 = vst [vmem:[%s1132_s25 + $0x120] sm:$0xff] %v489_v61  ;;  %618 = vst [vmem:[%s1132_s25 + $0x128] sm:$0xff] %v490_v62  ;;  %v368_v10 = vmul.f32 %v1098_v1, %v239_v58  ;;  %v369_v11 = vmul.f32 %v1098_v1, %v240_v59  ;;  %v493_v15 = vadd.f32 %v1103_v5, %v364_v3  ;;  %v260_v61 = vld [vmem:[%s1091_s11 + $0x208] sm:$0xff]  ;;  %v261_v62 = vld [vmem:[%s1091_s11 + $0x210] sm:$0xff] }
  0x59   : > { %619 = vst [vmem:[%s1132_s25 + $0x130] sm:$0xff] %v491_v2  ;;  %v494_v16 = vadd.f32 %v1103_v5, %v365_v4  ;;  %v495_v17 = vadd.f32 %v1103_v5, %v366_v6  ;;  %v370_v18 = vmul.f32 %v1098_v1, %v241_v0  ;;  %620 = vst [vmem:[%s1132_s25 + $0x138] sm:$0xff] %v492_v8  ;;  %v262_v4 = vld [vmem:[%s1091_s11 + $0x218] sm:$0xff]  ;;  %v263_v6 = vld [vmem:[%s1091_s11 + $0x220] sm:$0xff] }
  0x5a   : > { %v496_v22 = vadd.f32 %v1103_v5, %v367_v9  ;;  %v497_v23 = vadd.f32 %v1103_v5, %v368_v10  ;;  %v498_v24 = vadd.f32 %v1103_v5, %v369_v11  ;;  %v371_v25 = vmul.f32 %v1098_v1, %v242_v7  ;;  %621 = vst [vmem:[%s1132_s25 + $0x140] sm:$0xff] %v493_v15  ;;  %v264_v7 = vld [vmem:[%s1091_s11 + $0x228] sm:$0xff] }
  0x5b   : > { %622 = vst [vmem:[%s1132_s25 + $0x148] sm:$0xff] %v494_v16  ;;  %623 = vst [vmem:[%s1132_s25 + $0x150] sm:$0xff] %v495_v17  ;;  %v499_v27 = vadd.f32 %v1103_v5, %v370_v18  ;;  %v372_v28 = vmul.f32 %v1098_v1, %v243_v12  ;;  %v373_v29 = vmul.f32 %v1098_v1, %v244_v13  ;;  %v265_v12 = vld [vmem:[%s1091_s11 + $0x230] sm:$0xff]  ;;  %v266_v17 = vld [vmem:[%s1091_s11 + $0x238] sm:$0xff] }
  0x5c   : > { %v374_v30 = vmul.f32 %v1098_v1, %v245_v14  ;;  %624 = vst [vmem:[%s1132_s25 + $0x158] sm:$0xff] %v496_v22  ;;  %625 = vst [vmem:[%s1132_s25 + $0x160] sm:$0xff] %v497_v23  ;;  %v500_v32 = vadd.f32 %v1103_v5, %v371_v25  ;;  %v375_v33 = vmul.f32 %v1098_v1, %v246_v19  ;;  %v267_v22 = vld [vmem:[%s1091_s11 + $0x240] sm:$0xff]  ;;  %v268_v23 = vld [vmem:[%s1091_s11 + $0x248] sm:$0xff] }
  0x5d   : > { %626 = vst [vmem:[%s1132_s25 + $0x168] sm:$0xff] %v498_v24  ;;  %v376_v34 = vmul.f32 %v1098_v1, %v247_v20  ;;  %v377_v35 = vmul.f32 %v1098_v1, %v248_v21  ;;  %627 = vst [vmem:[%s1132_s25 + $0x170] sm:$0xff] %v499_v27  ;;  %v501_v39 = vadd.f32 %v1103_v5, %v372_v28  ;;  %v269_v24 = vld [vmem:[%s1091_s11 + $0x250] sm:$0xff] }
  0x5e   : > { %v502_v40 = vadd.f32 %v1103_v5, %v373_v29  ;;  %v503_v41 = vadd.f32 %v1103_v5, %v374_v30  ;;  %v378_v42 = vmul.f32 %v1098_v1, %v249_v26  ;;  %628 = vst [vmem:[%s1132_s25 + $0x178] sm:$0xff] %v500_v32  ;;  %v504_v46 = vadd.f32 %v1103_v5, %v375_v33  ;;  %v270_v29 = vld [vmem:[%s1091_s11 + $0x258] sm:$0xff]  ;;  %v271_v30 = vld [vmem:[%s1091_s11 + $0x260] sm:$0xff] }
  0x5f   : > { %v505_v47 = vadd.f32 %v1103_v5, %v376_v34  ;;  %v506_v48 = vadd.f32 %v1103_v5, %v377_v35  ;;  %v379_v49 = vmul.f32 %v1098_v1, %v250_v31  ;;  %629 = vst [vmem:[%s1132_s25 + $0x180] sm:$0xff] %v501_v39  ;;  %v380_v52 = vmul.f32 %v1098_v1, %v251_v36  ;;  %v272_v31 = vld [vmem:[%s1091_s11 + $0x268] sm:$0xff]  ;;  %v273_v36 = vld [vmem:[%s1091_s11 + $0x270] sm:$0xff] }
  0x60   : > { %630 = vst [vmem:[%s1132_s25 + $0x188] sm:$0xff] %v502_v40  ;;  %631 = vst [vmem:[%s1132_s25 + $0x190] sm:$0xff] %v503_v41  ;;  %v507_v51 = vadd.f32 %v1103_v5, %v378_v42  ;;  %v381_v53 = vmul.f32 %v1098_v1, %v252_v37  ;;  %v382_v54 = vmul.f32 %v1098_v1, %v253_v38  ;;  %v274_v41 = vld [vmem:[%s1091_s11 + $0x278] sm:$0xff] }
  0x61   : > { %632 = vst [vmem:[%s1132_s25 + $0x198] sm:$0xff] %v504_v46  ;;  %633 = vst [vmem:[%s1132_s25 + $0x1a0] sm:$0xff] %v505_v47  ;;  %v508_v56 = vadd.f32 %v1103_v5, %v379_v49  ;;  %v383_v57 = vmul.f32 %v1098_v1, %v254_v43  ;;  %v384_v58 = vmul.f32 %v1098_v1, %v255_v44  ;;  %v275_v46 = vld [vmem:[%s1091_s11 + $0x280] sm:$0xff]  ;;  %v276_v47 = vld [vmem:[%s1091_s11 + $0x288] sm:$0xff] }
  0x62   : > { %634 = vst [vmem:[%s1132_s25 + $0x1a8] sm:$0xff] %v506_v48  ;;  %v385_v59 = vmul.f32 %v1098_v1, %v256_v45  ;;  %635 = vst [vmem:[%s1132_s25 + $0x1b0] sm:$0xff] %v507_v51  ;;  %v509_v63 = vadd.f32 %v1103_v5, %v380_v52  ;;  %v510_v0 = vadd.f32 %v1103_v5, %v381_v53  ;;  %v277_v48 = vld [vmem:[%s1091_s11 + $0x290] sm:$0xff]  ;;  %v278_v53 = vld [vmem:[%s1091_s11 + $0x298] sm:$0xff] }
  0x63   : > { %v511_v2 = vadd.f32 %v1103_v5, %v382_v54  ;;  %v386_v3 = vmul.f32 %v1098_v1, %v257_v50  ;;  %636 = vst [vmem:[%s1132_s25 + $0x1b8] sm:$0xff] %v508_v56  ;;  %v512_v8 = vadd.f32 %v1103_v5, %v383_v57  ;;  %v513_v9 = vadd.f32 %v1103_v5, %v384_v58  ;;  %v279_v54 = vld [vmem:[%s1091_s11 + $0x2a0] sm:$0xff] }
  0x64   : > { %v514_v10 = vadd.f32 %v1103_v5, %v385_v59  ;;  %v387_v11 = vmul.f32 %v1098_v1, %v258_v55  ;;  %637 = vst [vmem:[%s1132_s25 + $0x1c0] sm:$0xff] %v509_v63  ;;  %638 = vst [vmem:[%s1132_s25 + $0x1c8] sm:$0xff] %v510_v0  ;;  %v388_v14 = vmul.f32 %v1098_v1, %v259_v60  ;;  %v280_v55 = vld [vmem:[%s1091_s11 + $0x2a8] sm:$0xff]  ;;  %v281_v60 = vld [vmem:[%s1091_s11 + $0x2b0] sm:$0xff] }
  0x65   : > { %639 = vst [vmem:[%s1132_s25 + $0x1d0] sm:$0xff] %v511_v2  ;;  %v515_v13 = vadd.f32 %v1103_v5, %v386_v3  ;;  %v389_v15 = vmul.f32 %v1098_v1, %v260_v61  ;;  %v390_v16 = vmul.f32 %v1098_v1, %v261_v62  ;;  %640 = vst [vmem:[%s1132_s25 + $0x1d8] sm:$0xff] %v512_v8  ;;  %v282_v2 = vld [vmem:[%s1091_s11 + $0x2b8] sm:$0xff]  ;;  %v283_v8 = vld [vmem:[%s1091_s11 + $0x2c0] sm:$0xff] }
  0x66   : > { %641 = vst [vmem:[%s1132_s25 + $0x1e0] sm:$0xff] %v513_v9  ;;  %642 = vst [vmem:[%s1132_s25 + $0x1e8] sm:$0xff] %v514_v10  ;;  %v516_v18 = vadd.f32 %v1103_v5, %v387_v11  ;;  %v391_v19 = vmul.f32 %v1098_v1, %v262_v4  ;;  %v392_v20 = vmul.f32 %v1098_v1, %v263_v6  ;;  %v284_v9 = vld [vmem:[%s1091_s11 + $0x2c8] sm:$0xff]  ;;  %v285_v10 = vld [vmem:[%s1091_s11 + $0x2d0] sm:$0xff] }
  0x67   : > { %v393_v21 = vmul.f32 %v1098_v1, %v264_v7  ;;  %643 = vst [vmem:[%s1132_s25 + $0x1f0] sm:$0xff] %v515_v13  ;;  %v517_v25 = vadd.f32 %v1103_v5, %v388_v14  ;;  %v518_v26 = vadd.f32 %v1103_v5, %v389_v15  ;;  %v519_v27 = vadd.f32 %v1103_v5, %v390_v16  ;;  %v286_v15 = vld [vmem:[%s1091_s11 + $0x2d8] sm:$0xff]  ;;  %v287_v16 = vld [vmem:[%s1091_s11 + $0x2e0] sm:$0xff] }
  0x68   : > { %v394_v28 = vmul.f32 %v1098_v1, %v265_v12  ;;  %644 = vst [vmem:[%s1132_s25 + $0x1f8] sm:$0xff] %v516_v18  ;;  %v520_v32 = vadd.f32 %v1103_v5, %v391_v19  ;;  %v521_v33 = vadd.f32 %v1103_v5, %v392_v20  ;;  %v395_v35 = vmul.f32 %v1098_v1, %v266_v17  ;;  %v288_v17 = vld [vmem:[%s1091_s11 + $0x2e8] sm:$0xff] }
  0x69   : > { %v522_v34 = vadd.f32 %v1103_v5, %v393_v21  ;;  %645 = vst [vmem:[%s1132_s25 + $0x200] sm:$0xff] %v517_v25  ;;  %646 = vst [vmem:[%s1132_s25 + $0x208] sm:$0xff] %v518_v26  ;;  %v396_v38 = vmul.f32 %v1098_v1, %v267_v22  ;;  %v397_v39 = vmul.f32 %v1098_v1, %v268_v23  ;;  %v289_v22 = vld [vmem:[%s1091_s11 + $0x2f0] sm:$0xff] }
  0x6a   : > { %647 = vst [vmem:[%s1132_s25 + $0x210] sm:$0xff] %v519_v27  ;;  %v523_v37 = vadd.f32 %v1103_v5, %v394_v28  ;;  %v398_v40 = vmul.f32 %v1098_v1, %v269_v24  ;;  %648 = vst [vmem:[%s1132_s25 + $0x218] sm:$0xff] %v520_v32  ;;  %v524_v42 = vadd.f32 %v1103_v5, %v395_v35  ;;  %v290_v27 = vld [vmem:[%s1091_s11 + $0x2f8] sm:$0xff]  ;;  %v291_v32 = vld [vmem:[%s1091_s11 + $0x300] sm:$0xff] }
  0x6b   : > { %649 = vst [vmem:[%s1132_s25 + $0x220] sm:$0xff] %v521_v33  ;;  %650 = vst [vmem:[%s1132_s25 + $0x228] sm:$0xff] %v522_v34  ;;  %v399_v43 = vmul.f32 %v1098_v1, %v270_v29  ;;  %v400_v44 = vmul.f32 %v1098_v1, %v271_v30  ;;  %v401_v45 = vmul.f32 %v1098_v1, %v272_v31  ;;  %v292_v33 = vld [vmem:[%s1091_s11 + $0x308] sm:$0xff]  ;;  %v293_v34 = vld [vmem:[%s1091_s11 + $0x310] sm:$0xff] }
  0x6c   : > { %651 = vst [vmem:[%s1132_s25 + $0x230] sm:$0xff] %v523_v37  ;;  %v525_v49 = vadd.f32 %v1103_v5, %v396_v38  ;;  %v526_v50 = vadd.f32 %v1103_v5, %v397_v39  ;;  %v527_v51 = vadd.f32 %v1103_v5, %v398_v40  ;;  %v402_v52 = vmul.f32 %v1098_v1, %v273_v36  ;;  %v294_v39 = vld [vmem:[%s1091_s11 + $0x318] sm:$0xff]  ;;  %v295_v40 = vld [vmem:[%s1091_s11 + $0x320] sm:$0xff] }
  0x6d   : > { %652 = vst [vmem:[%s1132_s25 + $0x238] sm:$0xff] %v524_v42  ;;  %v528_v56 = vadd.f32 %v1103_v5, %v399_v43  ;;  %v529_v57 = vadd.f32 %v1103_v5, %v400_v44  ;;  %v530_v58 = vadd.f32 %v1103_v5, %v401_v45  ;;  %v403_v59 = vmul.f32 %v1098_v1, %v274_v41  ;;  %v296_v41 = vld [vmem:[%s1091_s11 + $0x328] sm:$0xff] }
  0x6e   : > { %653 = vst [vmem:[%s1132_s25 + $0x240] sm:$0xff] %v525_v49  ;;  %654 = vst [vmem:[%s1132_s25 + $0x248] sm:$0xff] %v526_v50  ;;  %v531_v61 = vadd.f32 %v1103_v5, %v402_v52  ;;  %v404_v62 = vmul.f32 %v1098_v1, %v275_v46  ;;  %v405_v63 = vmul.f32 %v1098_v1, %v276_v47  ;;  %v297_v46 = vld [vmem:[%s1091_s11 + $0x330] sm:$0xff] }
  0x6f   : > { %655 = vst [vmem:[%s1132_s25 + $0x250] sm:$0xff] %v527_v51  ;;  %v406_v0 = vmul.f32 %v1098_v1, %v277_v48  ;;  %656 = vst [vmem:[%s1132_s25 + $0x258] sm:$0xff] %v528_v56  ;;  %v532_v3 = vadd.f32 %v1103_v5, %v403_v59  ;;  %v407_v4 = vmul.f32 %v1098_v1, %v278_v53  ;;  %v298_v51 = vld [vmem:[%s1091_s11 + $0x338] sm:$0xff]  ;;  %v299_v56 = vld [vmem:[%s1091_s11 + $0x340] sm:$0xff] }
  0x70   : > { %657 = vst [vmem:[%s1132_s25 + $0x260] sm:$0xff] %v529_v57  ;;  %658 = vst [vmem:[%s1132_s25 + $0x268] sm:$0xff] %v530_v58  ;;  %v408_v6 = vmul.f32 %v1098_v1, %v279_v54  ;;  %v409_v7 = vmul.f32 %v1098_v1, %v280_v55  ;;  %v533_v11 = vadd.f32 %v1103_v5, %v404_v62  ;;  %v300_v57 = vld [vmem:[%s1091_s11 + $0x348] sm:$0xff]  ;;  %v301_v58 = vld [vmem:[%s1091_s11 + $0x350] sm:$0xff] }
  0x71   : > { %659 = vst [vmem:[%s1132_s25 + $0x270] sm:$0xff] %v531_v61  ;;  %v534_v12 = vadd.f32 %v1103_v5, %v405_v63  ;;  %v535_v13 = vadd.f32 %v1103_v5, %v406_v0  ;;  %v410_v14 = vmul.f32 %v1098_v1, %v281_v60  ;;  %660 = vst [vmem:[%s1132_s25 + $0x278] sm:$0xff] %v532_v3  ;;  %v302_v63 = vld [vmem:[%s1091_s11 + $0x358] sm:$0xff]  ;;  %v303_v0 = vld [vmem:[%s1091_s11 + $0x360] sm:$0xff] }
  0x72   : > { %v536_v18 = vadd.f32 %v1103_v5, %v407_v4  ;;  %v537_v19 = vadd.f32 %v1103_v5, %v408_v6  ;;  %v538_v20 = vadd.f32 %v1103_v5, %v409_v7  ;;  %v411_v21 = vmul.f32 %v1098_v1, %v282_v2  ;;  %661 = vst [vmem:[%s1132_s25 + $0x280] sm:$0xff] %v533_v11  ;;  %v304_v2 = vld [vmem:[%s1091_s11 + $0x368] sm:$0xff] }
  0x73   : > { %662 = vst [vmem:[%s1132_s25 + $0x288] sm:$0xff] %v534_v12  ;;  %663 = vst [vmem:[%s1132_s25 + $0x290] sm:$0xff] %v535_v13  ;;  %v539_v23 = vadd.f32 %v1103_v5, %v410_v14  ;;  %v412_v24 = vmul.f32 %v1098_v1, %v283_v8  ;;  %v413_v25 = vmul.f32 %v1098_v1, %v284_v9  ;;  %v305_v8 = vld [vmem:[%s1091_s11 + $0x370] sm:$0xff]  ;;  %v306_v13 = vld [vmem:[%s1091_s11 + $0x378] sm:$0xff] }
  0x74   : > { %v414_v26 = vmul.f32 %v1098_v1, %v285_v10  ;;  %664 = vst [vmem:[%s1132_s25 + $0x298] sm:$0xff] %v536_v18  ;;  %665 = vst [vmem:[%s1132_s25 + $0x2a0] sm:$0xff] %v537_v19  ;;  %v540_v28 = vadd.f32 %v1103_v5, %v411_v21  ;;  %v415_v29 = vmul.f32 %v1098_v1, %v286_v15  ;;  %v307_v18 = vld [vmem:[%s1091_s11 + $0x380] sm:$0xff]  ;;  %v308_v19 = vld [vmem:[%s1091_s11 + $0x388] sm:$0xff] }
  0x75   : > { %666 = vst [vmem:[%s1132_s25 + $0x2a8] sm:$0xff] %v538_v20  ;;  %v416_v30 = vmul.f32 %v1098_v1, %v287_v16  ;;  %v417_v31 = vmul.f32 %v1098_v1, %v288_v17  ;;  %667 = vst [vmem:[%s1132_s25 + $0x2b0] sm:$0xff] %v539_v23  ;;  %v541_v35 = vadd.f32 %v1103_v5, %v412_v24  ;;  %v309_v20 = vld [vmem:[%s1091_s11 + $0x390] sm:$0xff] }
  0x76   : > { %v542_v36 = vadd.f32 %v1103_v5, %v413_v25  ;;  %v543_v37 = vadd.f32 %v1103_v5, %v414_v26  ;;  %v418_v38 = vmul.f32 %v1098_v1, %v289_v22  ;;  %668 = vst [vmem:[%s1132_s25 + $0x2b8] sm:$0xff] %v540_v28  ;;  %v544_v42 = vadd.f32 %v1103_v5, %v415_v29  ;;  %v310_v25 = vld [vmem:[%s1091_s11 + $0x398] sm:$0xff]  ;;  %v311_v26 = vld [vmem:[%s1091_s11 + $0x3a0] sm:$0xff] }
  0x77   : > { %v545_v43 = vadd.f32 %v1103_v5, %v416_v30  ;;  %v546_v44 = vadd.f32 %v1103_v5, %v417_v31  ;;  %v419_v45 = vmul.f32 %v1098_v1, %v290_v27  ;;  %669 = vst [vmem:[%s1132_s25 + $0x2c0] sm:$0xff] %v541_v35  ;;  %v420_v48 = vmul.f32 %v1098_v1, %v291_v32  ;;  %v312_v27 = vld [vmem:[%s1091_s11 + $0x3a8] sm:$0xff]  ;;  %v313_v32 = vld [vmem:[%s1091_s11 + $0x3b0] sm:$0xff] }
  0x78   : > { %670 = vst [vmem:[%s1132_s25 + $0x2c8] sm:$0xff] %v542_v36  ;;  %671 = vst [vmem:[%s1132_s25 + $0x2d0] sm:$0xff] %v543_v37  ;;  %v547_v47 = vadd.f32 %v1103_v5, %v418_v38  ;;  %v421_v49 = vmul.f32 %v1098_v1, %v292_v33  ;;  %v422_v50 = vmul.f32 %v1098_v1, %v293_v34  ;;  %v314_v37 = vld [vmem:[%s1091_s11 + $0x3b8] sm:$0xff] }
  0x79   : > { %672 = vst [vmem:[%s1132_s25 + $0x2d8] sm:$0xff] %v544_v42  ;;  %673 = vst [vmem:[%s1132_s25 + $0x2e0] sm:$0xff] %v545_v43  ;;  %v548_v52 = vadd.f32 %v1103_v5, %v419_v45  ;;  %v423_v53 = vmul.f32 %v1098_v1, %v294_v39  ;;  %v424_v54 = vmul.f32 %v1098_v1, %v295_v40  ;;  %v315_v42 = vld [vmem:[%s1091_s11 + $0x3c0] sm:$0xff]  ;;  %v316_v43 = vld [vmem:[%s1091_s11 + $0x3c8] sm:$0xff] }
  0x7a   : > { %674 = vst [vmem:[%s1132_s25 + $0x2e8] sm:$0xff] %v546_v44  ;;  %v425_v55 = vmul.f32 %v1098_v1, %v296_v41  ;;  %675 = vst [vmem:[%s1132_s25 + $0x2f0] sm:$0xff] %v547_v47  ;;  %v549_v59 = vadd.f32 %v1103_v5, %v420_v48  ;;  %v550_v60 = vadd.f32 %v1103_v5, %v421_v49  ;;  %v317_v44 = vld [vmem:[%s1091_s11 + $0x3d0] sm:$0xff]  ;;  %v318_v49 = vld [vmem:[%s1091_s11 + $0x3d8] sm:$0xff] }
  0x7b   : > { %v551_v61 = vadd.f32 %v1103_v5, %v422_v50  ;;  %v426_v62 = vmul.f32 %v1098_v1, %v297_v46  ;;  %676 = vst [vmem:[%s1132_s25 + $0x2f8] sm:$0xff] %v548_v52  ;;  %v552_v3 = vadd.f32 %v1103_v5, %v423_v53  ;;  %v553_v4 = vadd.f32 %v1103_v5, %v424_v54  ;;  %v319_v50 = vld [vmem:[%s1091_s11 + $0x3e0] sm:$0xff] }
  0x7c   : > { %v554_v6 = vadd.f32 %v1103_v5, %v425_v55  ;;  %v427_v7 = vmul.f32 %v1098_v1, %v298_v51  ;;  %677 = vst [vmem:[%s1132_s25 + $0x300] sm:$0xff] %v549_v59  ;;  %678 = vst [vmem:[%s1132_s25 + $0x308] sm:$0xff] %v550_v60  ;;  %v428_v10 = vmul.f32 %v1098_v1, %v299_v56  ;;  %v320_v51 = vld [vmem:[%s1091_s11 + $0x3e8] sm:$0xff]  ;;  %v321_v56 = vld [vmem:[%s1091_s11 + $0x3f0] sm:$0xff] }
  0x7d   : > { %679 = vst [vmem:[%s1132_s25 + $0x310] sm:$0xff] %v551_v61  ;;  %v555_v9 = vadd.f32 %v1103_v5, %v426_v62  ;;  %v429_v11 = vmul.f32 %v1098_v1, %v300_v57  ;;  %v430_v12 = vmul.f32 %v1098_v1, %v301_v58  ;;  %680 = vst [vmem:[%s1132_s25 + $0x318] sm:$0xff] %v552_v3  ;;  %v322_v61 = vld [vmem:[%s1091_s11 + $0x3f8] sm:$0xff] }
  0x7e   : > { %681 = vst [vmem:[%s1132_s25 + $0x320] sm:$0xff] %v553_v4  ;;  %682 = vst [vmem:[%s1132_s25 + $0x328] sm:$0xff] %v554_v6  ;;  %v556_v14 = vadd.f32 %v1103_v5, %v427_v7  ;;  %v431_v15 = vmul.f32 %v1098_v1, %v302_v63  ;;  %v432_v16 = vmul.f32 %v1098_v1, %v303_v0 }
  0x7f   : > { %v433_v17 = vmul.f32 %v1098_v1, %v304_v2  ;;  %683 = vst [vmem:[%s1132_s25 + $0x330] sm:$0xff] %v555_v9  ;;  %v557_v21 = vadd.f32 %v1103_v5, %v428_v10  ;;  %v558_v22 = vadd.f32 %v1103_v5, %v429_v11  ;;  %v559_v23 = vadd.f32 %v1103_v5, %v430_v12 }
  0x80   : > { %v434_v24 = vmul.f32 %v1098_v1, %v305_v8  ;;  %684 = vst [vmem:[%s1132_s25 + $0x338] sm:$0xff] %v556_v14  ;;  %v560_v28 = vadd.f32 %v1103_v5, %v431_v15  ;;  %v561_v29 = vadd.f32 %v1103_v5, %v432_v16  ;;  %v435_v31 = vmul.f32 %v1098_v1, %v306_v13 }
  0x81   : > { %v562_v30 = vadd.f32 %v1103_v5, %v433_v17  ;;  %685 = vst [vmem:[%s1132_s25 + $0x340] sm:$0xff] %v557_v21  ;;  %686 = vst [vmem:[%s1132_s25 + $0x348] sm:$0xff] %v558_v22  ;;  %v436_v34 = vmul.f32 %v1098_v1, %v307_v18  ;;  %v437_v35 = vmul.f32 %v1098_v1, %v308_v19 }
  0x82   : > { %687 = vst [vmem:[%s1132_s25 + $0x350] sm:$0xff] %v559_v23  ;;  %v563_v33 = vadd.f32 %v1103_v5, %v434_v24  ;;  %v438_v36 = vmul.f32 %v1098_v1, %v309_v20  ;;  %688 = vst [vmem:[%s1132_s25 + $0x358] sm:$0xff] %v560_v28  ;;  %v564_v38 = vadd.f32 %v1103_v5, %v435_v31 }
  0x83   : > { %689 = vst [vmem:[%s1132_s25 + $0x360] sm:$0xff] %v561_v29  ;;  %690 = vst [vmem:[%s1132_s25 + $0x368] sm:$0xff] %v562_v30  ;;  %v439_v39 = vmul.f32 %v1098_v1, %v310_v25  ;;  %v440_v40 = vmul.f32 %v1098_v1, %v311_v26  ;;  %v441_v41 = vmul.f32 %v1098_v1, %v312_v27 }
  0x84   : > { %691 = vst [vmem:[%s1132_s25 + $0x370] sm:$0xff] %v563_v33  ;;  %v565_v45 = vadd.f32 %v1103_v5, %v436_v34  ;;  %v566_v46 = vadd.f32 %v1103_v5, %v437_v35  ;;  %v567_v47 = vadd.f32 %v1103_v5, %v438_v36  ;;  %v442_v48 = vmul.f32 %v1098_v1, %v313_v32 }
  0x85   : > { %692 = vst [vmem:[%s1132_s25 + $0x378] sm:$0xff] %v564_v38  ;;  %v568_v52 = vadd.f32 %v1103_v5, %v439_v39  ;;  %v569_v53 = vadd.f32 %v1103_v5, %v440_v40  ;;  %v570_v54 = vadd.f32 %v1103_v5, %v441_v41  ;;  %v443_v55 = vmul.f32 %v1098_v1, %v314_v37 }
  0x86   : > { %693 = vst [vmem:[%s1132_s25 + $0x380] sm:$0xff] %v565_v45  ;;  %694 = vst [vmem:[%s1132_s25 + $0x388] sm:$0xff] %v566_v46  ;;  %v571_v57 = vadd.f32 %v1103_v5, %v442_v48  ;;  %v444_v58 = vmul.f32 %v1098_v1, %v315_v42  ;;  %v445_v59 = vmul.f32 %v1098_v1, %v316_v43 }
  0x87   : > { %695 = vst [vmem:[%s1132_s25 + $0x390] sm:$0xff] %v567_v47  ;;  %v446_v60 = vmul.f32 %v1098_v1, %v317_v44  ;;  %696 = vst [vmem:[%s1132_s25 + $0x398] sm:$0xff] %v568_v52  ;;  %v572_v62 = vadd.f32 %v1103_v5, %v443_v55  ;;  %v447_v63 = vmul.f32 %v1098_v1, %v318_v49 }
  0x88   : > { %697 = vst [vmem:[%s1132_s25 + $0x3a0] sm:$0xff] %v569_v53  ;;  %698 = vst [vmem:[%s1132_s25 + $0x3a8] sm:$0xff] %v570_v54  ;;  %v448_v0 = vmul.f32 %v1098_v1, %v319_v50  ;;  %v449_v2 = vmul.f32 %v1098_v1, %v320_v51  ;;  %v573_v3 = vadd.f32 %v1103_v5, %v444_v58 }
  0x89   : > { %699 = vst [vmem:[%s1132_s25 + $0x3b0] sm:$0xff] %v571_v57  ;;  %v574_v4 = vadd.f32 %v1103_v5, %v445_v59  ;;  %v575_v6 = vadd.f32 %v1103_v5, %v446_v60  ;;  %v450_v7 = vmul.f32 %v1098_v1, %v321_v56  ;;  %700 = vst [vmem:[%s1132_s25 + $0x3b8] sm:$0xff] %v572_v62 }
  0x8a   : > { %v576_v8 = vadd.f32 %v1103_v5, %v447_v63  ;;  %v577_v9 = vadd.f32 %v1103_v5, %v448_v0  ;;  %v578_v10 = vadd.f32 %v1103_v5, %v449_v2  ;;  %v451_v11 = vmul.f32 %v1098_v1, %v322_v61  ;;  %701 = vst [vmem:[%s1132_s25 + $0x3c0] sm:$0xff] %v573_v3 }
  0x8b   : > { %702 = vst [vmem:[%s1132_s25 + $0x3c8] sm:$0xff] %v574_v4  ;;  %703 = vst [vmem:[%s1132_s25 + $0x3d0] sm:$0xff] %v575_v6  ;;  %v579_v12 = vadd.f32 %v1103_v5, %v450_v7 }
  0x8c   : > { %704 = vst [vmem:[%s1132_s25 + $0x3d8] sm:$0xff] %v576_v8  ;;  %705 = vst [vmem:[%s1132_s25 + $0x3e0] sm:$0xff] %v577_v9  ;;  %v580_v13 = vadd.f32 %v1103_v5, %v451_v11 }
  0x8d   : > { %706 = vst [vmem:[%s1132_s25 + $0x3e8] sm:$0xff] %v578_v10  ;;  %707 = vst [vmem:[%s1132_s25 + $0x3f0] sm:$0xff] %v579_v12 }
  0x8e   : > { %708 = vst [vmem:[%s1132_s25 + $0x3f8] sm:$0xff] %v580_v13 }
  0x8f   : > { %903 = shalt.err (!%p900_p10)
}
  0x90   : > { %s904_s24 = scalar_lea.hbm %s1616_s13, 16384  ;;  %s908_s30 = scalar_lea.hbm %s1670_s3, 32768 }
  0x91   : > { %p905_p0 = scmp.ne.s32.totalorder %s1616_s13, %s904_s24  ;;  %p909_p1 = scmp.lt.s32.totalorder %s1616_s13, %s1670_s3 }
  0x92   : > { %p910_p3 = scmp.lt.s32.totalorder %s908_s30, %s904_s24 }
  0x93   : > { %p906_p2 = pnand %p905_p0, %p1679_p12 }
  0x94   : > { %p911_p6 = por %p910_p3, %p909_p1 }
  0x95   : > { %p907_p9 = pneg %p906_p2 }
  0x97   : > { %p912_p11 = pnand %p911_p6, %p907_p9 }
  0x99   : > { %915 = shalt.err (!%p912_p11)
}
  0x9a   : > { %s960_s11 = smov 128   ;;  %s961_s6 = smov 8  }
  0x9b   : > { %814 = dma.vmem_to_hbm [thread:$0]  (%p1679_p12), %s1622_s10, 16384, %s1616_s13, %s710_s14, %s960_s11, %s960_s11, %s961_s6  }
  0x9c PF: > { %s738_s8 = sand.u32 1, %s942_s16   ;;  %p1680_p13 = scmp.ne.s32.totalorder %s1676_s27, 0 }
  0x9d   : > { %p1681_p4 = scmp.ge.s32.totalorder %s954_s19, 2  ;;  %s739_s25 = scalar_lea.sflag [#allocation6], %s738_s8 }
  0x9f   : > { %p821_p5 = pnand %p1681_p4, %p1680_p13 }
  0xa1   : > { %p822_p7 = pneg %p821_p5 }
  0xa3   : > { %937 = dma.done.wait (%p822_p7), %s739_s25, 16384  }
  0xa4   : > { %939 = vsyncadd (%p822_p7), %s739_s25, 4294950912  ;;  %p18_p8 = scmp.ge.s32.totalorder %s1013_s20, 4   ;;  %s1682_s16 = smov %s946_s17 }
  0xa5   : > { %s1683_s17 = smov %s950_s18  ;;  %s1684_s18 = smov %s1025_s23 }
  0xa6   : > { %s1685_s19 = smov %s1013_s20  ;;  %20 = sbr.rel (!%p18_p8) target bundleno = 8 (0x8), region = 77 }
  0xab   :  { %744 = vsyncpa [#allocation5], 1 }
  0xac   :  { %746 = vsyncpa [#allocation5 + $0x1], 1 }
  0xad   :  { %747 = vsyncpa [#allocation6], 1 }
  0xae   :  { %749 = vsyncpa [#allocation6 + $0x1], 1 }

</bundles_post_ra>
